<compile_context>
chip_gen: v6e
topology: v6e:2x2x1
jax: 0.10.0
libtpu: 0.0.40
codegen_flags: <defaults>
</compile_context>

<pallas_src>
import functools

import jax
import jax.numpy as jnp
from jax.experimental import pallas as pl
from jax.experimental.pallas import tpu as pltpu


def _round_up(x, m):
    return (x + m - 1) // m * m


def _pad_to(a, shape):
    """Zero-pad array `a` up to `shape` (no-op if already that shape)."""
    if tuple(a.shape) == tuple(shape):
        return a
    pads = [(0, t - s) for s, t in zip(a.shape, shape)]
    return jnp.pad(a, pads)


def mlp_kernel(x_ref, w1_ref, b1_ref, w2_ref, b2_ref, out_ref, acc_ref, *, inv_s):
    """Grid = (batch_tiles, seq_tiles); seq is the reduction axis (last)."""
    s = pl.program_id(1)

    # Fold the sequence mean into the first matmul:
    #   mean_s(x) @ W1 == (1/S) * sum_s (x_s @ W1) == (1/S) * ((sum_s x_s) @ W1)
    # Accumulate the un-scaled partial product; scale once at finalize.
    x = x_ref[...]                                          # (tb, ts, D_p)
    xsum = jnp.sum(x.astype(jnp.float32), axis=1)           # (tb, D_p)  XLU reduce
    partial = jnp.dot(
        xsum.astype(w1_ref.dtype), w1_ref[...],
        preferred_element_type=jnp.float32)                 # (tb, H_p) f32

    @pl.when(s == 0)
    def _init():
        acc_ref[...] = partial                              # no zero-init + RMW

    @pl.when(s != 0)
    def _accum():
        acc_ref[...] += partial

    @pl.when(s == pl.num_programs(1) - 1)
    def _finalize():
        # Bias adds / ReLU / second matmul only once, outside the reduction loop.
        h = acc_ref[...] * inv_s + b1_ref[...].astype(jnp.float32)
        h = jnp.maximum(h, 0.0)                             # ReLU (VPU, f32)
        y = jnp.dot(h.astype(w2_ref.dtype), w2_ref[...],
                    preferred_element_type=jnp.float32)
        y = y + b2_ref[...].astype(jnp.float32)
        out_ref[...] = y.astype(out_ref.dtype)              # lane-dense (tb, H_p)


def mlp_forward(x, w1, b1, w2, b2, *, block_b=None, block_s=None):
    """x: (B, S, D_in); w1: (D_in, H) (= lin1.weight.T); b1: (1, H) or (H,);
    w2: (H, H) (= lin2.weight.T); b2: (1, H) or (H,).  Returns (B, H)."""
    B, S, D = x.shape
    H = w1.shape[1]

    # --- pad to TPU-native shapes -------------------------------------------
    D_p = _round_up(D, 128)          # lane axis of x tile / K of first matmul
    H_p = _round_up(H, 128)          # lane-dense hidden + output
    itemsize = jnp.dtype(x.dtype).itemsize

    if block_b is None:
        block_b = min(_round_up(B, 8), 128)
    if block_s is None:
        # Largest seq tile whose double-buffered x DMAs + resident weights +
        # output/accumulator stay under ~12 MiB (fits every chip's default
        # scoped-VMEM limit with headroom).
        budget = 12 << 20
        fixed = 2 * (D_p * H_p + H_p * H_p + 2 * H_p) * itemsize   # weights/biases
        fixed += 2 * block_b * H_p * itemsize                      # output tile
        fixed += block_b * H_p * 4                                 # f32 accumulator
        block_s = 8
        for cand in (512, 256, 128, 64, 32, 16, 8):
            if fixed + 2 * block_b * cand * D_p * itemsize <= budget:
                block_s = cand
                break
        block_s = min(block_s, _round_up(S, 8))

    B_p = _round_up(B, block_b)
    S_p = _round_up(S, block_s)

    x_p = _pad_to(x, (B_p, S_p, D_p))
    w1_p = _pad_to(w1, (D_p, H_p))
    b1_p = _pad_to(b1.reshape(1, -1), (1, H_p))
    w2_p = _pad_to(w2, (H_p, H_p))
    b2_p = _pad_to(b2.reshape(1, -1), (1, H_p))

    grid = (B_p // block_b, S_p // block_s)
    kernel = functools.partial(mlp_kernel, inv_s=1.0 / S)   # true S, not padded

    out_p = pl.pallas_call(
        kernel,
        out_shape=jax.ShapeDtypeStruct((B_p, H_p), x.dtype),
        grid_spec=pltpu.PrefetchScalarGridSpec(
            num_scalar_prefetch=0,
            grid=grid,
            in_specs=[
                # x: tiled over (batch, seq); full (padded) feature dim.
                pl.BlockSpec((block_b, block_s, D_p), lambda b, s: (b, s, 0)),
                # weights / biases: constant index_map -> loaded once, resident.
                pl.BlockSpec((D_p, H_p), lambda b, s: (0, 0)),
                pl.BlockSpec((1, H_p), lambda b, s: (0, 0)),
                pl.BlockSpec((H_p, H_p), lambda b, s: (0, 0)),
                pl.BlockSpec((1, H_p), lambda b, s: (0, 0)),
            ],
            # Same output block for every seq step -> resident tile, written
            # only in the finalize branch.
            out_specs=pl.BlockSpec((block_b, H_p), lambda b, s: (b, 0)),
            scratch_shapes=[pltpu.VMEM((block_b, H_p), jnp.float32)],
        ),
        compiler_params=pltpu.CompilerParams(
            dimension_semantics=("parallel", "arbitrary"),
        ),
    )(x_p, w1_p, b1_p, w2_p, b2_p)

    return out_p[:B, :H]


def mlp_reference(x, w1, b1, w2, b2):
    xm = jnp.mean(x, axis=1)
    h = jnp.maximum(xm @ w1 + b1.reshape(1, -1), 0.0)
    return h @ w2 + b2.reshape(1, -1)


if __name__ == "__main__":
    B, S, D_in, H = 2, 8, 32, 32   # batch, seq, input_size, output_size

    key = jax.random.PRNGKey(0)
    kx, kw1, kb1, kw2, kb2 = jax.random.split(key, 5)

    x = jax.random.normal(kx, (B, S, D_in), dtype=jnp.float32)

    # Deterministic params; emulate torch.nn.Linear's uniform(-1/sqrt(fan_in), +) init.
    bound1 = 1.0 / (D_in ** 0.5)
    w1 = jax.random.uniform(kw1, (D_in, H), jnp.float32, -bound1, bound1)   # lin1.weight.T
    b1 = jax.random.uniform(kb1, (1, H), jnp.float32, -bound1, bound1)      # lin1.bias
    bound2 = 1.0 / (H ** 0.5)
    w2 = jax.random.uniform(kw2, (H, H), jnp.float32, -bound2, bound2)      # lin2.weight.T
    b2 = jax.random.uniform(kb2, (1, H), jnp.float32, -bound2, bound2)      # lin2.bias

    out = mlp_forward(x, w1, b1, w2, b2)
    out = jax.block_until_ready(out)

    ref = mlp_reference(x, w1, b1, w2, b2)
    assert out.shape == (B, H)
    assert jnp.allclose(out, ref, atol=1e-5, rtol=1e-5), "mismatch vs reference"

    print("KERNEL_OK")
</pallas_src>

<mosaic_0001>
module attributes {stable_mosaic.version = 11 : i64} {
  func.func @mlp_kernel(%arg0: i32, %arg1: i32, %arg2: memref<8x8x128xf32, #tpu.memory_space<vmem>>, %arg3: memref<128x128xf32, #tpu.memory_space<vmem>>, %arg4: memref<1x128xf32, #tpu.memory_space<vmem>>, %arg5: memref<128x128xf32, #tpu.memory_space<vmem>>, %arg6: memref<1x128xf32, #tpu.memory_space<vmem>>, %arg7: memref<8x128xf32, #tpu.memory_space<vmem>>, %arg8: memref<8x128xf32, #tpu.memory_space<vmem>>) attributes {dimension_semantics = [#tpu.dimension_semantics<parallel>, #tpu.dimension_semantics<arbitrary>], iteration_bounds = array<i64: 1, 1>, scalar_prefetch = 0 : i64, scratch_operands = 1 : i64, tpu.core_type = #tpu.core_type<tc>, window_params = [{transform_indices = @transform_0, window_bounds = array<i64: 8, 8, 128>}, {pipeline_mode = #tpu.pipeline_mode<synchronous>, transform_indices = @transform_1, window_bounds = array<i64: 128, 128>}, {pipeline_mode = #tpu.pipeline_mode<synchronous>, transform_indices = @transform_2, window_bounds = array<i64: 1, 128>}, {pipeline_mode = #tpu.pipeline_mode<synchronous>, transform_indices = @transform_3, window_bounds = array<i64: 128, 128>}, {pipeline_mode = #tpu.pipeline_mode<synchronous>, transform_indices = @transform_4, window_bounds = array<i64: 1, 128>}, {transform_indices = @transform_5, window_bounds = array<i64: 8, 128>}]} {
    %c0 = arith.constant 0 : index
    %c0_0 = arith.constant 0 : index
    %c0_1 = arith.constant 0 : index
    %0 = vector.load %arg2[%c0, %c0_0, %c0_1] : memref<8x8x128xf32, #tpu.memory_space<vmem>>, vector<8x8x128xf32>
    %cst = arith.constant dense<0.000000e+00> : vector<8x128xf32>
    %1 = vector.multi_reduction <add>, %0, %cst [1] : vector<8x8x128xf32> to vector<8x128xf32>
    %c0_2 = arith.constant 0 : index
    %c0_3 = arith.constant 0 : index
    %2 = vector.load %arg3[%c0_2, %c0_3] : memref<128x128xf32, #tpu.memory_space<vmem>>, vector<128x128xf32>
    %cst_4 = arith.constant dense<0.000000e+00> : vector<8x128xf32>
    %3 = tpu.matmul %1, %2, %cst_4 {dimension_numbers = #tpu.dot_dimension_numbers<[1], [0], [0], [1], [0, 0, 1, 1], [], []>} : vector<8x128xf32>, vector<128x128xf32>, vector<8x128xf32> -> vector<8x128xf32>
    %c0_i32 = arith.constant 0 : i32
    %4 = arith.cmpi eq, %arg1, %c0_i32 : i32
    %5 = arith.extui %4 : i1 to i32
    %c0_i32_5 = arith.constant 0 : i32
    %6 = arith.cmpi ne, %5, %c0_i32_5 : i32
    scf.if %6 {
      %c0_10 = arith.constant 0 : index
      %c0_11 = arith.constant 0 : index
      %13 = vector.load %arg8[%c0_10, %c0_11] : memref<8x128xf32, #tpu.memory_space<vmem>>, vector<8x128xf32>
      tpu.vector_store %arg8[%c0_10, %c0_11], %3 {strides = array<i32>} : memref<8x128xf32, #tpu.memory_space<vmem>>, vector<8x128xf32>,
    } else {
    }
    %c0_i32_6 = arith.constant 0 : i32
    %7 = arith.cmpi ne, %arg1, %c0_i32_6 : i32
    %8 = arith.extui %7 : i1 to i32
    %c0_i32_7 = arith.constant 0 : i32
    %9 = arith.cmpi ne, %8, %c0_i32_7 : i32
    scf.if %9 {
      %c0_10 = arith.constant 0 : index
      %c0_11 = arith.constant 0 : index
      %13 = vector.load %arg8[%c0_10, %c0_11] : memref<8x128xf32, #tpu.memory_space<vmem>>, vector<8x128xf32>
      %14 = arith.addf %13, %3 : vector<8x128xf32>
      %c0_12 = arith.constant 0 : index
      %c0_13 = arith.constant 0 : index
      %15 = vector.load %arg8[%c0_12, %c0_13] : memref<8x128xf32, #tpu.memory_space<vmem>>, vector<8x128xf32>
      tpu.vector_store %arg8[%c0_12, %c0_13], %14 {strides = array<i32>} : memref<8x128xf32, #tpu.memory_space<vmem>>, vector<8x128xf32>,
    } else {
    }
    %c0_i32_8 = arith.constant 0 : i32
    %10 = arith.cmpi eq, %arg1, %c0_i32_8 : i32
    %11 = arith.extui %10 : i1 to i32
    %c0_i32_9 = arith.constant 0 : i32
    %12 = arith.cmpi ne, %11, %c0_i32_9 : i32
    scf.if %12 {
      %c0_10 = arith.constant 0 : index
      %c0_11 = arith.constant 0 : index
      %13 = vector.load %arg8[%c0_10, %c0_11] : memref<8x128xf32, #tpu.memory_space<vmem>>, vector<8x128xf32>
      %cst_12 = arith.constant 1.250000e-01 : f32
      %14 = vector.broadcast %cst_12 : f32 to vector<8x128xf32>
      %15 = arith.mulf %13, %14 : vector<8x128xf32>
      %c0_13 = arith.constant 0 : index
      %c0_14 = arith.constant 0 : index
      %16 = vector.load %arg4[%c0_13, %c0_14] : memref<1x128xf32, #tpu.memory_space<vmem>>, vector<1x128xf32>
      %17 = vector.broadcast %16 : vector<1x128xf32> to vector<8x128xf32>
      %18 = arith.addf %15, %17 : vector<8x128xf32>
      %cst_15 = arith.constant 0.000000e+00 : f32
      %19 = vector.broadcast %cst_15 : f32 to vector<8x128xf32>
      %20 = arith.maximumf %18, %19 : vector<8x128xf32>
      %c0_16 = arith.constant 0 : index
      %c0_17 = arith.constant 0 : index
      %21 = vector.load %arg5[%c0_16, %c0_17] : memref<128x128xf32, #tpu.memory_space<vmem>>, vector<128x128xf32>
      %cst_18 = arith.constant dense<0.000000e+00> : vector<8x128xf32>
      %22 = tpu.matmul %20, %21, %cst_18 {dimension_numbers = #tpu.dot_dimension_numbers<[1], [0], [0], [1], [0, 0, 1, 1], [], []>} : vector<8x128xf32>, vector<128x128xf32>, vector<8x128xf32> -> vector<8x128xf32>
      %c0_19 = arith.constant 0 : index
      %c0_20 = arith.constant 0 : index
      %23 = vector.load %arg6[%c0_19, %c0_20] : memref<1x128xf32, #tpu.memory_space<vmem>>, vector<1x128xf32>
      %24 = vector.broadcast %23 : vector<1x128xf32> to vector<8x128xf32>
      %25 = arith.addf %22, %24 : vector<8x128xf32>
      %c0_21 = arith.constant 0 : index
      %c0_22 = arith.constant 0 : index
      %26 = vector.load %arg7[%c0_21, %c0_22] : memref<8x128xf32, #tpu.memory_space<vmem>>, vector<8x128xf32>
      tpu.vector_store %arg7[%c0_21, %c0_22], %25 {strides = array<i32>} : memref<8x128xf32, #tpu.memory_space<vmem>>, vector<8x128xf32>,
    } else {
    }
    return
  }
  func.func @transform_0(%arg0: i32, %arg1: i32) -> (i32, i32, i32) {
    %c0_i32 = arith.constant 0 : i32
    %c0_i32_0 = arith.constant 0 : i32
    return %arg0, %arg1, %c0_i32 : i32, i32, i32
  }
  func.func @transform_1(%arg0: i32, %arg1: i32) -> (i32, i32) {
    %c0_i32 = arith.constant 0 : i32
    %c0_i32_0 = arith.constant 0 : i32
    %c0_i32_1 = arith.constant 0 : i32
    return %c0_i32, %c0_i32_0 : i32, i32
  }
  func.func @transform_2(%arg0: i32, %arg1: i32) -> (i32, i32) {
    %c0_i32 = arith.constant 0 : i32
    %c0_i32_0 = arith.constant 0 : i32
    %c0_i32_1 = arith.constant 0 : i32
    return %c0_i32, %c0_i32_0 : i32, i32
  }
  func.func @transform_3(%arg0: i32, %arg1: i32) -> (i32, i32) {
    %c0_i32 = arith.constant 0 : i32
    %c0_i32_0 = arith.constant 0 : i32
    %c0_i32_1 = arith.constant 0 : i32
    return %c0_i32, %c0_i32_0 : i32, i32
  }
  func.func @transform_4(%arg0: i32, %arg1: i32) -> (i32, i32) {
    %c0_i32 = arith.constant 0 : i32
    %c0_i32_0 = arith.constant 0 : i32
    %c0_i32_1 = arith.constant 0 : i32
    return %c0_i32, %c0_i32_0 : i32, i32
  }
  func.func @transform_5(%arg0: i32, %arg1: i32) -> (i32, i32) {
    %c0_i32 = arith.constant 0 : i32
    %c0_i32_0 = arith.constant 0 : i32
    return %arg0, %c0_i32 : i32, i32
  }
}

</mosaic_0001>

<bundles_post_ra>
// kernel: tpu_custom_call.1
= control target key start
LH: loop header
LB: loop body
LE: loop exit
PB: predicated region body
PF: predicated region fallthrough
CT: control target
= control target key end

     0   :  { %10 = vsyncpa [#allocation4], 0  ;;  %s655_s0 = inlined_call_operand.hbm [shape: f32[8,8,128], index: 0, kind: input, shape index: {}]   ;;  %s656_s1 = inlined_call_operand.hbm [shape: f32[128,128], index: 1, kind: input, shape index: {}]   ;;  %s657_s2 = inlined_call_operand.vmem [shape: f32[1,128], index: 2, kind: input, shape index: {}]   ;;  %s658_s3 = inlined_call_operand.hbm [shape: f32[128,128], index: 3, kind: input, shape index: {}]   ;;  %s659_s4 = inlined_call_operand.vmem [shape: f32[1,128], index: 4, kind: input, shape index: {}]   ;;  %s660_s5 = inlined_call_operand.hbm [shape: f32[8,128], index: 5, kind: output, shape index: {}]  }
   0x1   :  { %11 = vsyncpa [#allocation7], 0 }
   0x2   :  { %12 = vsyncpa [#allocation5], 0  ;;  %s563_s18 = smov [#allocation6]   ;;  %s564_s20 = smov [#allocation3]  }
   0x3   :  { %s30_s19 = sshll.u32 %s563_s18, 4  ;;  %s18_s21 = sshll.u32 %s564_s20, 4  ;;  %s31_s19 = int_to_ptr.vmem [resolvable:$true] %s30_s19  ;;  %s19_s21 = int_to_ptr.vmem [resolvable:$true] %s18_s21 }
   0x4   :  { %s485_s22 = scalar_lea.vmem %s31_s19, 2048  ;;  %p490_p1 = scmp.lt.s32.totalorder %s31_s19, %s31_s19 }
   0x5   :  { %p486_p0 = scmp.ne.s32.totalorder %s31_s19, %s485_s22  ;;  %p491_p2 = scmp.lt.s32.totalorder %s485_s22, %s485_s22 }
   0x7   :  { %p492_p3 = por %p491_p2, %p490_p1 }
   0x9   :  { %p493_p4 = pnand %p492_p3, %p486_p0 }
   0xb   :  { %496 = shalt.err (!%p493_p4)
}
   0xc   :  { %s565_s23 = smov 128   ;;  %s566_s24 = smov 8  }
   0xd   :  { %36 = dma.hbm_to_vmem [thread:$0]  %s656_s1, 2048, %s31_s19, [#allocation7], %s565_s23, %s565_s23, %s566_s24  }
   0xe   :  { %s505_s27 = scalar_lea.vmem %s19_s21, 1024  ;;  %p510_p6 = scmp.lt.s32.totalorder %s19_s21, %s19_s21 }
   0xf   :  { %p506_p5 = scmp.ne.s32.totalorder %s19_s21, %s505_s27  ;;  %p511_p7 = scmp.lt.s32.totalorder %s505_s27, %s505_s27 }
  0x11   :  { %p512_p8 = por %p511_p7, %p510_p6 }
  0x13   :  { %p513_p9 = pnand %p512_p8, %p506_p5 }
  0x15   :  { %516 = shalt.err (!%p513_p9)
}
  0x16   :  { %24 = dma.hbm_to_vmem [thread:$0]  %s655_s0, 1024, %s19_s21, [#allocation4], %s565_s23, %s565_s23, %s566_s24  }
  0x17   :  { %s567_s30 = smov [#allocation8]  }
  0x18   :  { %s44_s6 = sshll.u32 %s567_s30, 4  ;;  %s45_s6 = int_to_ptr.vmem [resolvable:$true] %s44_s6 }
  0x19   :  { %s525_s7 = scalar_lea.vmem %s45_s6, 2048  ;;  %p530_p11 = scmp.lt.s32.totalorder %s45_s6, %s45_s6 }
  0x1a   :  { %p526_p10 = scmp.ne.s32.totalorder %s45_s6, %s525_s7  ;;  %p531_p12 = scmp.lt.s32.totalorder %s525_s7, %s525_s7 }
  0x1c   :  { %p532_p13 = por %p531_p12, %p530_p11 }
  0x1e   :  { %p533_p0 = pnand %p532_p13, %p526_p10 }
  0x20   :  { %536 = shalt.err (!%p533_p0)
}
  0x21   :  { %50 = dma.hbm_to_vmem [thread:$0]  %s658_s3, 2048, %s45_s6, [#allocation7], %s565_s23, %s565_s23, %s566_s24  }
  0x22   :  { %557 = dma.done.wait [#allocation4], 1024  }
  0x23   :  { %558 = vsyncadd [#allocation4], 4294966272 }
  0x24   :  { %559 = dma.done.wait [#allocation7], 4096  }
  0x25   :  { %560 = vsyncadd [#allocation7], 4294963200  ;;  %v568_v0 = vmov 0.0   ;;  %vm569_vm0 = vmmov 0   ;;  %v133_v1 = vld [vmem:[#allocation6 + $0x78] sm:$0xff]  ;;  %v132_v2 = vld [vmem:[#allocation6 + $0x70] sm:$0xff] }
  0x26   :  { %399 = vmatprep.subr.mxu0 %v568_v0  ;;  %431 = vmatprep.mubr.msk.f32.mxu0 %vm569_vm0, %v568_v0  ;;  %v131_v3 = vld [vmem:[#allocation6 + $0x68] sm:$0xff]  ;;  %v130_v4 = vld [vmem:[#allocation6 + $0x60] sm:$0xff]  ;;  %v129_v5 = vld [vmem:[#allocation6 + $0x58] sm:$0xff]  ;;  %vm142_vm1 = vcmask 1041409   ;;  %vm144_vm2 = vcmask 1042434   ;;  %vm146_vm3 = vcmask 1043459  }
  0x27   :  { %434 = vmatprep.subr.mxu1 %v568_v0  ;;  %466 = vmatprep.mubr.msk.f32.mxu1 %vm569_vm0, %v568_v0  ;;  %v62_v6 = vld [vmem:[#allocation3] sm:$0xff]  ;;  %v63_v7 = vld [vmem:[#allocation3 + $0x8] sm:$0xff]  ;;  %v64_v8 = vld [vmem:[#allocation3 + $0x10] sm:$0xff]  ;;  %vm148_vm4 = vcmask 1044484   ;;  %vm150_vm5 = vcmask 1045509   ;;  %vm152_vm6 = vcmask 1046534  }
  0x28   :  { %400 = vmatpush3.msra.mxu0 %v133_v1  ;;  %v65_v9 = vld [vmem:[#allocation3 + $0x18] sm:$0xff]  ;;  %v66_v10 = vld [vmem:[#allocation3 + $0x20] sm:$0xff]  ;;  %v70_v11 = vrot.slane %v62_v6, 4  ;;  %v76_v12 = vrot.slane %v63_v7, 4  ;;  %v67_v13 = vld [vmem:[#allocation3 + $0x28] sm:$0xff]  ;;  %v82_v16 = vrot.slane %v64_v8, 4 }
  0x29   :  { %401 = vmatprep.subr.mxu0 %v568_v0  ;;  %v68_v14 = vld [vmem:[#allocation3 + $0x30] sm:$0xff]  ;;  %v69_v15 = vld [vmem:[#allocation3 + $0x38] sm:$0xff]  ;;  %v88_v17 = vrot.slane %v65_v9, 4  ;;  %v94_v18 = vrot.slane %v66_v10, 4  ;;  %v100_v22 = vrot.slane %v67_v13, 4  ;;  %v127_v30 = vld [vmem:[#allocation6 + $0x48] sm:$0xff] }
  0x2a   :  { %402 = vmatpush3.msra.mxu0 %v132_v2  ;;  %v128_v19 = vld [vmem:[#allocation6 + $0x50] sm:$0xff]  ;;  %v71_v20 = vadd.f32 %v70_v11, %v62_v6  ;;  %v77_v21 = vadd.f32 %v76_v12, %v63_v7  ;;  %v106_v23 = vrot.slane %v68_v14, 4  ;;  %v268_v24 = vld [vmem:[#allocation8 + $0x78] sm:$0xff]  ;;  %v83_v26 = vadd.f32 %v82_v16, %v64_v8  ;;  %v266_v35 = vld [vmem:[#allocation8 + $0x68] sm:$0xff]  ;;  %s570_s11 = smov [#allocation9]  }
  0x2b   :  { %403 = vmatprep.subr.mxu0 %v568_v0  ;;  %v267_v25 = vld [vmem:[#allocation8 + $0x70] sm:$0xff]  ;;  %v89_v27 = vadd.f32 %v88_v17, %v65_v9  ;;  %v95_v28 = vadd.f32 %v94_v18, %v66_v10  ;;  %v112_v29 = vrot.slane %v69_v15, 4  ;;  %435 = vmatpush3.msra.mxu1 %v268_v24  ;;  %v101_v33 = vadd.f32 %v100_v22, %v67_v13  ;;  %v126_v40 = vld [vmem:[#allocation6 + $0x40] sm:$0xff]  ;;  %v125_v50 = vld [vmem:[#allocation6 + $0x38] sm:$0xff]  ;;  %s353_s12 = sshll.u32 %s570_s11, 4  ;;  %s354_s12 = int_to_ptr.vmem [resolvable:$true] %s353_s12 }
  0x2c   :  { %404 = vmatpush3.msra.mxu0 %v131_v3  ;;  %v72_v31 = vrot.slane %v71_v20, 2  ;;  %v78_v32 = vrot.slane %v77_v21, 2  ;;  %v107_v34 = vadd.f32 %v106_v23, %v68_v14  ;;  %436 = vmatprep.subr.mxu1 %v568_v0  ;;  %v84_v36 = vrot.slane %v83_v26, 2  ;;  %v265_v45 = vld [vmem:[#allocation8 + $0x60] sm:$0xff]  ;;  %v264_v55 = vld [vmem:[#allocation8 + $0x58] sm:$0xff]  ;;  %v124_v59 = vld [vmem:[#allocation6 + $0x30] sm:$0xff]  ;;  %p542_p2 = scmp.lt.s32.totalorder %s354_s12, %s354_s12 }
  0x2d   :  { %405 = vmatprep.subr.mxu0 %v568_v0  ;;  %v90_v37 = vrot.slane %v89_v27, 2  ;;  %v96_v38 = vrot.slane %v95_v28, 2  ;;  %v113_v39 = vadd.f32 %v112_v29, %v69_v15  ;;  %437 = vmatpush3.msra.mxu1 %v267_v25  ;;  %v102_v43 = vrot.slane %v101_v33, 2  ;;  %v263_v1 = vld [vmem:[#allocation8 + $0x50] sm:$0xff]  ;;  %v262_v8 = vld [vmem:[#allocation8 + $0x48] sm:$0xff]  ;;  %v122_v11 = vld [vmem:[#allocation6 + $0x20] sm:$0xff] }
  0x2e   :  { %406 = vmatpush3.msra.mxu0 %v130_v4  ;;  %v73_v41 = vadd.f32 %v72_v31, %v71_v20  ;;  %v79_v42 = vadd.f32 %v78_v32, %v77_v21  ;;  %v108_v44 = vrot.slane %v107_v34, 2  ;;  %438 = vmatprep.subr.mxu1 %v568_v0  ;;  %v85_v46 = vadd.f32 %v84_v36, %v83_v26  ;;  %v261_v13 = vld [vmem:[#allocation8 + $0x40] sm:$0xff]  ;;  %v121_v16 = vld [vmem:[#allocation6 + $0x18] sm:$0xff]  ;;  %v120_v20 = vld [vmem:[#allocation6 + $0x10] sm:$0xff]  ;;  %s537_s13 = scalar_lea.vmem %s354_s12, 128 }
  0x2f   :  { %407 = vmatprep.subr.mxu0 %v568_v0  ;;  %v91_v47 = vadd.f32 %v90_v37, %v89_v27  ;;  %v97_v48 = vadd.f32 %v96_v38, %v95_v28  ;;  %v114_v49 = vrot.slane %v113_v39, 2  ;;  %439 = vmatpush3.msra.mxu1 %v266_v35  ;;  %v103_v53 = vadd.f32 %v102_v43, %v101_v33  ;;  %v260_v18 = vld [vmem:[#allocation8 + $0x38] sm:$0xff]  ;;  %v259_v21 = vld [vmem:[#allocation8 + $0x30] sm:$0xff]  ;;  %v119_v23 = vld [vmem:[#allocation6 + $0x8] sm:$0xff]  ;;  %p538_p1 = scmp.ne.s32.totalorder %s354_s12, %s537_s13  ;;  %p543_p3 = scmp.lt.s32.totalorder %s537_s13, %s537_s13 }
  0x30   :  { %408 = vmatpush3.msra.mxu0 %v129_v5  ;;  %v74_v51 = vrot.slane %v73_v41, 1  ;;  %v80_v52 = vrot.slane %v79_v42, 1  ;;  %v109_v54 = vadd.f32 %v108_v44, %v107_v34  ;;  %440 = vmatprep.subr.mxu1 %v568_v0  ;;  %v86_v56 = vrot.slane %v85_v46, 1  ;;  %v123_v5 = vld [vmem:[#allocation6 + $0x28] sm:$0xff]  ;;  %v118_v26 = vld [vmem:[#allocation6] sm:$0xff]  ;;  %v256_v29 = vld [vmem:[#allocation8 + $0x18] sm:$0xff] }
  0x31   :  { %409 = vmatprep.subr.mxu0 %v568_v0  ;;  %v92_v57 = vrot.slane %v91_v47, 1  ;;  %v98_v58 = vrot.slane %v97_v48, 1  ;;  %441 = vmatpush3.msra.mxu1 %v265_v45  ;;  %v104_v62 = vrot.slane %v103_v53, 1  ;;  %v115_v63 = vadd.f32 %v114_v49, %v113_v39  ;;  %v258_v25 = vld [vmem:[#allocation8 + $0x28] sm:$0xff]  ;;  %v257_v27 = vld [vmem:[#allocation8 + $0x20] sm:$0xff]  ;;  %p544_p4 = por %p543_p3, %p542_p2 }
  0x32   :  { %410 = vmatpush3.msra.mxu0 %v128_v19  ;;  %v75_v60 = vadd.f32 %v74_v51, %v73_v41  ;;  %v81_v61 = vadd.f32 %v80_v52, %v79_v42  ;;  %442 = vmatprep.subr.mxu1 %v568_v0  ;;  %v87_v2 = vadd.f32 %v86_v56, %v85_v46  ;;  %v110_v6 = vrot.slane %v109_v54, 1  ;;  %v254_v31 = vld [vmem:[#allocation8 + $0x8] sm:$0xff]  ;;  %v253_v32 = vld [vmem:[#allocation8] sm:$0xff] }
  0x33   :  { %411 = vmatprep.subr.mxu0 %v568_v0  ;;  %v93_v3 = vadd.f32 %v92_v57, %v91_v47  ;;  %v99_v4 = vadd.f32 %v98_v58, %v97_v48  ;;  %443 = vmatpush3.msra.mxu1 %v264_v55  ;;  %v105_v9 = vadd.f32 %v104_v62, %v103_v53  ;;  %v116_v14 = vrot.slane %v115_v63, 1  ;;  %v363_v34 = vld [vmem:[%s657_s2] ss:$0 sm:$0xff]  ;;  %p545_p5 = pnand %p544_p4, %p538_p1 }
  0x34   :  { %412 = vmatpush3.msra.mxu0 %v127_v30  ;;  %v143_v7 = vsel %vm142_vm1, %v81_v61, %v75_v60  ;;  %444 = vmatprep.subr.mxu1 %v568_v0  ;;  %v111_v17 = vadd.f32 %v110_v6, %v109_v54  ;;  %vm154_vm7 = vcmask 1047559   ;;  %v255_v30 = vld [vmem:[#allocation8 + $0x10] sm:$0xff]  ;;  %v364_v39 = vld [vmem:[%s659_s4] ss:$0 sm:$0xff] }
  0x35   :  { %413 = vmatprep.subr.mxu0 %v568_v0  ;;  %v145_v10 = vsel %vm144_vm2, %v87_v2, %v143_v7  ;;  %445 = vmatpush3.msra.mxu1 %v263_v1  ;;  %v117_v22 = vadd.f32 %v116_v14, %v115_v63 }
  0x36   :  { %414 = vmatpush3.msra.mxu0 %v126_v40  ;;  %v147_v12 = vsel %vm146_vm3, %v93_v3, %v145_v10  ;;  %446 = vmatprep.subr.mxu1 %v568_v0 }
  0x37   :  { %415 = vmatprep.subr.mxu0 %v568_v0  ;;  %v149_v15 = vsel %vm148_vm4, %v99_v4, %v147_v12  ;;  %447 = vmatpush3.msra.mxu1 %v262_v8 }
  0x38   :  { %416 = vmatpush3.msra.mxu0 %v125_v50  ;;  %448 = vmatprep.subr.mxu1 %v568_v0  ;;  %v151_v19 = vsel %vm150_vm5, %v105_v9, %v149_v15 }
  0x39   :  { %417 = vmatprep.subr.mxu0 %v568_v0  ;;  %449 = vmatpush3.msra.mxu1 %v261_v13  ;;  %v153_v24 = vsel %vm152_vm6, %v111_v17, %v151_v19 }
  0x3a   :  { %418 = vmatpush3.msra.mxu0 %v124_v59  ;;  %450 = vmatprep.subr.mxu1 %v568_v0  ;;  %v155_v28 = vsel %vm154_vm7, %v117_v22, %v153_v24 }
  0x3b   :  { %419 = vmatprep.subr.mxu0 %v568_v0  ;;  %451 = vmatpush3.msra.mxu1 %v260_v18 }
  0x3c   :  { %420 = vmatpush3.msra.mxu0 %v123_v5  ;;  %452 = vmatprep.subr.mxu1 %v568_v0 }
  0x3d   :  { %421 = vmatprep.subr.mxu0 %v568_v0  ;;  %453 = vmatpush3.msra.mxu1 %v259_v21 }
  0x3e   :  { %422 = vmatpush3.msra.mxu0 %v122_v11  ;;  %454 = vmatprep.subr.mxu1 %v568_v0 }
  0x3f   :  { %423 = vmatprep.subr.mxu0 %v568_v0  ;;  %455 = vmatpush3.msra.mxu1 %v258_v25 }
  0x40   :  { %424 = vmatpush3.msra.mxu0 %v121_v16  ;;  %456 = vmatprep.subr.mxu1 %v568_v0 }
  0x41   :  { %425 = vmatprep.subr.mxu0 %v568_v0  ;;  %457 = vmatpush3.msra.mxu1 %v257_v27 }
  0x42   :  { %426 = vmatpush3.msra.mxu0 %v120_v20  ;;  %458 = vmatprep.subr.mxu1 %v568_v0 }
  0x43   :  { %427 = vmatprep.subr.mxu0 %v568_v0  ;;  %459 = vmatpush3.msra.mxu1 %v256_v29 }
  0x44   :  { %428 = vmatpush3.msra.mxu0 %v119_v23  ;;  %460 = vmatprep.subr.mxu1 %v568_v0 }
  0x45   :  { %429 = vmatprep.subr.mxu0 %v568_v0  ;;  %461 = vmatpush3.msra.mxu1 %v255_v30 }
  0x46   :  { %430 = vmatpush3.msra.mxu0 %v118_v26  ;;  %462 = vmatprep.subr.mxu1 %v568_v0 }
  0x47   :  { %432 = vmatmul.mubr.f32.vlgmr.msra.gmra.mxu0 %v155_v28  ;;  %463 = vmatpush3.msra.mxu1 %v254_v31 }
  0x48   :  { %464 = vmatprep.subr.mxu1 %v568_v0 }
  0x49   :  { %465 = vmatpush3.msra.mxu1 %v253_v32 }
 0x107   :  { %v223_v33 = vpop.f32.mrf.mxu0 }
 0x108   :  { %v243_v35 = vmul.f32 0.125, %v223_v33 }
 0x109   :  { %v433_v36 = vpop.f32.mrf.mxu0 }
 0x10a   :  { %v251_v37 = vadd.f32 %v363_v34, %v243_v35 }
 0x10c   :  { %v252_v38 = vmax.f32 %v251_v37, 0.0 }
 0x10e   :  { %467 = vmatmul.mubr.f32.vlgmr.msra.gmra.mxu1 %v252_v38 }
 0x1ce   :  { %v342_v40 = vpop.f32.mrf.mxu1 }
 0x1cf   :  { %v343_v0 = vadd.f32 %v364_v39, %v342_v40 }
 0x1d0   :  { %v468_v41 = vpop.f32.mrf.mxu1 }
 0x1d1   :  { %346 = vst [vmem:[#allocation9] sm:$0xff] %v343_v0 }
 0x1d2   :  { %548 = shalt.err (!%p545_p5)
}
 0x1d3   :  { %356 = dma.vmem_to_hbm [thread:$0]  %s354_s12, 128, %s660_s5, [#allocation5]  }
 0x1d4   :  { %561 = dma.done.wait [#allocation5], 128  }
 0x1d5   :  { %562 = vsyncadd [#allocation5], 4294967168 }
 0x1d6   :  { %360 = vsyncpa [#allocation4], 1 }
 0x1d7   :  { %361 = vsyncpa [#allocation7], 1 }
 0x1d8   :  { %362 = vsyncpa [#allocation5], 1 }

</bundles_post_ra>
